<compile_context>
chip_gen: v6e
topology: v6e:2x2x1
jax: 0.10.0
libtpu: 0.0.40
codegen_flags: <defaults>
</compile_context>

<pallas_src>
import functools
import math

import numpy as np
import jax
import jax.numpy as jnp
from jax.experimental import pallas as pl
from jax.experimental.pallas import tpu as pltpu

_LANES = 128
_SUBLANES = 8


# --------------------------------- Pallas kernel ----------------------------------

def _charbonnier_kernel(xy_ref, out_ref, *, eps, total, block_elems, need_mask):
    x = xy_ref[0]                         # (block_rows, 128) f32
    y = xy_ref[1]                         # (block_rows, 128) f32
    d = x - y
    err = jnp.sqrt(d * d + eps)           # EUP sqrt, VPU mul/add

    if need_mask:                         # static Python branch (only if padded)
        rows, lanes = err.shape
        base = pl.program_id(0) * block_elems
        flat = (base
                + jax.lax.broadcasted_iota(jnp.int32, (rows, lanes), 0) * lanes
                + jax.lax.broadcasted_iota(jnp.int32, (rows, lanes), 1))
        err = jnp.where(flat < total, err, 0.0)

    blk_sum = jnp.sum(err)
    # Lane-dense, unmasked store: replicate the block partial over a full
    # (8, 128) tile; the wrapper reads [:, 0, 0].
    out_ref[...] = jnp.broadcast_to(blk_sum, out_ref.shape)


# ------------------------------------ wrapper --------------------------------------

def l1_charbonnier_loss(x, y, *, eps=1e-6, max_block_rows=2048):
    """Forward of L1_Charbonnier_Loss: sum(sqrt((x-y)^2 + eps)) / (H*W)."""
    N, C, H, W = x.shape
    total = N * C * H * W

    xf = x.reshape(-1).astype(jnp.float32)
    yf = y.reshape(-1).astype(jnp.float32)

    # Lane-dense layout: rows of 128 lanes, row count a multiple of 8 sublanes.
    rows = max(_SUBLANES, math.ceil(total / _LANES))
    block_rows = min(max_block_rows, rows)
    block_rows = ((block_rows + _SUBLANES - 1) // _SUBLANES) * _SUBLANES
    num_blocks = math.ceil(rows / block_rows)
    padded_rows = num_blocks * block_rows
    padded_total = padded_rows * _LANES
    pad = padded_total - total

    if pad:
        xf = jnp.pad(xf, (0, pad))
        yf = jnp.pad(yf, (0, pad))

    # Fuse both operands into one input array -> one BlockSpec / DMA stream.
    xy = jnp.stack([xf.reshape(padded_rows, _LANES),
                    yf.reshape(padded_rows, _LANES)], axis=0)   # (2, padded_rows, 128)

    kernel = functools.partial(
        _charbonnier_kernel,
        eps=float(eps),
        total=total,
        block_elems=block_rows * _LANES,
        need_mask=(pad > 0),
    )

    partials = pl.pallas_call(
        kernel,
        out_shape=jax.ShapeDtypeStruct((num_blocks, _SUBLANES, _LANES), jnp.float32),
        grid_spec=pltpu.PrefetchScalarGridSpec(
            num_scalar_prefetch=0,
            grid=(num_blocks,),
            in_specs=[
                pl.BlockSpec((2, block_rows, _LANES), lambda i: (0, i, 0)),
            ],
            out_specs=pl.BlockSpec((1, _SUBLANES, _LANES), lambda i: (i, 0, 0)),
        ),
        compiler_params=pltpu.CompilerParams(
            dimension_semantics=("parallel",)),
    )(xy)

    # Trailing tiny reduction over per-block partial sums (1 element per block).
    return jnp.sum(partials[:, 0, 0]) / float(H * W)


# ------------------------------ pure-JAX reference ----------------------------------

def ref_l1_charbonnier_loss(x, y, eps=1e-6):
    _, _, H, W = x.shape
    diff = x.astype(jnp.float32) - y.astype(jnp.float32)
    err = jnp.sqrt(diff * diff + eps)
    return jnp.sum(err) / (H * W)


# ------------------------------------- main -----------------------------------------

if __name__ == "__main__":
    key = jax.random.PRNGKey(0)
    k1, k2 = jax.random.split(key)
    x = jax.random.uniform(k1, (2, 4, 16, 16), dtype=jnp.float32)
    y = jax.random.uniform(k2, (2, 4, 16, 16), dtype=jnp.float32)

    out = l1_charbonnier_loss(x, y)
    out = jax.block_until_ready(out)

    ref = jax.block_until_ready(ref_l1_charbonnier_loss(x, y))
    np.testing.assert_allclose(np.asarray(out), np.asarray(ref), rtol=1e-4, atol=1e-5)

    print("KERNEL_OK")
</pallas_src>

<mosaic_0001>
module attributes {stable_mosaic.version = 11 : i64} {
  func.func @_charbonnier_kernel(%arg0: i32, %arg1: memref<2x16x128xf32, #tpu.memory_space<vmem>>, %arg2: memref<1x8x128xf32, #tpu.memory_space<vmem>>) attributes {dimension_semantics = [#tpu.dimension_semantics<parallel>], iteration_bounds = array<i64: 1>, scalar_prefetch = 0 : i64, scratch_operands = 0 : i64, tpu.core_type = #tpu.core_type<tc>, window_params = [{transform_indices = @transform_0, window_bounds = array<i64: 2, 16, 128>}, {transform_indices = @transform_1, window_bounds = array<i64: 1, 8, 128>}]} {
    %c0 = arith.constant 0 : index
    %c0_0 = arith.constant 0 : index
    %c0_1 = arith.constant 0 : index
    %0 = vector.load %arg1[%c0, %c0_0, %c0_1] : memref<2x16x128xf32, #tpu.memory_space<vmem>>, vector<1x16x128xf32>
    %1 = vector.shape_cast %0 : vector<1x16x128xf32> to vector<16x128xf32>
    %c1 = arith.constant 1 : index
    %c0_2 = arith.constant 0 : index
    %c0_3 = arith.constant 0 : index
    %2 = vector.load %arg1[%c1, %c0_2, %c0_3] : memref<2x16x128xf32, #tpu.memory_space<vmem>>, vector<1x16x128xf32>
    %3 = vector.shape_cast %2 : vector<1x16x128xf32> to vector<16x128xf32>
    %4 = arith.subf %1, %3 : vector<16x128xf32>
    %5 = arith.mulf %4, %4 : vector<16x128xf32>
    %cst = arith.constant 9.99999997E-7 : f32
    %6 = vector.broadcast %cst : f32 to vector<16x128xf32>
    %7 = arith.addf %5, %6 : vector<16x128xf32>
    %8 = math.sqrt %7 : vector<16x128xf32>
    %9 = vector.shape_cast %8 : vector<16x128xf32> to vector<1x16x128xf32>
    %cst_4 = arith.constant dense<0.000000e+00> : vector<1xf32>
    %10 = vector.multi_reduction <add>, %9, %cst_4 [1, 2] : vector<1x16x128xf32> to vector<1xf32>
    %11 = vector.shape_cast %10 : vector<1xf32> to vector<1x1x1xf32>
    %12 = vector.extract %11[0, 0, 0] : f32 from vector<1x1x1xf32>
    %13 = vector.broadcast %12 : f32 to vector<1x8x128xf32>
    %c0_5 = arith.constant 0 : index
    %c0_6 = arith.constant 0 : index
    %c0_7 = arith.constant 0 : index
    %14 = vector.load %arg2[%c0_5, %c0_6, %c0_7] : memref<1x8x128xf32, #tpu.memory_space<vmem>>, vector<1x8x128xf32>
    tpu.vector_store %arg2[%c0_5, %c0_6, %c0_7], %13 {strides = array<i32>} : memref<1x8x128xf32, #tpu.memory_space<vmem>>, vector<1x8x128xf32>,
    return
  }
  func.func @transform_0(%arg0: i32) -> (i32, i32, i32) {
    %c0_i32 = arith.constant 0 : i32
    %c0_i32_0 = arith.constant 0 : i32
    %c0_i32_1 = arith.constant 0 : i32
    return %c0_i32, %arg0, %c0_i32_0 : i32, i32, i32
  }
  func.func @transform_1(%arg0: i32) -> (i32, i32, i32) {
    %c0_i32 = arith.constant 0 : i32
    %c0_i32_0 = arith.constant 0 : i32
    %c0_i32_1 = arith.constant 0 : i32
    return %arg0, %c0_i32, %c0_i32_0 : i32, i32, i32
  }
}

</mosaic_0001>

<bundles_post_ra>
// kernel: tpu_custom_call.1
= control target key start
LH: loop header
LB: loop body
LE: loop exit
PB: predicated region body
PF: predicated region fallthrough
CT: control target
= control target key end

     0   :  { %6 = vsyncpa [#allocation3], 0  ;;  %s149_s0 = inlined_call_operand.hbm [shape: f32[2,16,128], index: 0, kind: input, shape index: {}]   ;;  %s150_s1 = inlined_call_operand.hbm [shape: f32[1,8,128], index: 1, kind: output, shape index: {}]  }
   0x1   :  { %7 = vsyncpa [#allocation4], 0  ;;  %s129_s6 = smov [#allocation2]  }
   0x2   :  { %s13_s7 = sshll.u32 %s129_s6, 4  ;;  %s14_s7 = int_to_ptr.vmem [resolvable:$true] %s13_s7 }
   0x3   :  { %s93_s8 = scalar_lea.vmem %s14_s7, 512  ;;  %p98_p1 = scmp.lt.s32.totalorder %s14_s7, %s14_s7 }
   0x4   :  { %p94_p0 = scmp.ne.s32.totalorder %s14_s7, %s93_s8  ;;  %p99_p2 = scmp.lt.s32.totalorder %s93_s8, %s93_s8 }
   0x6   :  { %p100_p3 = por %p99_p2, %p98_p1 }
   0x8   :  { %p101_p4 = pnand %p100_p3, %p94_p0 }
   0xa   :  { %104 = shalt.err (!%p101_p4)
}
   0xb   :  { %s130_s9 = smov 128   ;;  %s131_s10 = smov 8  }
   0xc   :  { %19 = dma.hbm_to_vmem [thread:$0]  %s149_s0, 512, %s14_s7, [#allocation3], %s130_s9, %s130_s9, %s131_s10  }
   0xd   :  { %125 = dma.done.wait [#allocation3], 512  }
   0xe   :  { %126 = vsyncadd [#allocation3], 4294966784  ;;  %v23_v0 = vld [vmem:[#allocation2] sm:$0xff]  ;;  %v24_v1 = vld [vmem:[#allocation2 + $0x8] sm:$0xff]  ;;  %s132_s0 = smov [#allocation5]  }
   0xf   :  { %v26_v2 = vld [vmem:[#allocation2 + $0x10] sm:$0xff]  ;;  %v27_v3 = vld [vmem:[#allocation2 + $0x18] sm:$0xff]  ;;  %s66_s13 = sshll.u32 %s132_s0, 4  ;;  %s67_s13 = int_to_ptr.vmem [resolvable:$true] %s66_s13 }
  0x10   :  { %v28_v4 = vsub.f32 %v23_v0, %v26_v2  ;;  %v29_v5 = vsub.f32 %v24_v1, %v27_v3  ;;  %s105_s15 = scalar_lea.vmem %s67_s13, 128  ;;  %p110_p6 = scmp.lt.s32.totalorder %s67_s13, %s67_s13 }
  0x11   :  { %p106_p5 = scmp.ne.s32.totalorder %s67_s13, %s105_s15  ;;  %p111_p7 = scmp.lt.s32.totalorder %s105_s15, %s105_s15 }
  0x12   :  { %v30_v6 = vmul.f32 %v28_v4, %v28_v4  ;;  %v31_v7 = vmul.f32 %v29_v5, %v29_v5 }
  0x13   :  { %p112_p8 = por %p111_p7, %p110_p6 }
  0x14   :  { %v32_v8 = vadd.f32 1e-06, %v30_v6  ;;  %v33_v9 = vadd.f32 1e-06, %v31_v7 }
  0x15   :  { %p113_p9 = pnand %p112_p8, %p106_p5 }
  0x16   :  { %81 = vrsqrt.f32 %v32_v8  ;;  %vm36_vm0 = vcmp.eq.f32.partialorder %v32_v8, inf  ;;  %v39_v11 = vand.u32 2147483648, %v32_v8  ;;  %vm38_vm1 = vcmp.eq.f32.partialorder %v32_v8, 0.0 }
  0x17   :  { %83 = vrsqrt.f32 %v33_v9  ;;  %vm43_vm2 = vcmp.eq.f32.partialorder %v33_v9, inf  ;;  %v46_v14 = vand.u32 2147483648, %v33_v9  ;;  %vm45_vm3 = vcmp.eq.f32.partialorder %v33_v9, 0.0 }
  0x23   :  { %v82_v10 = vpop.eup %81 }
  0x24   :  { %v84_v12 = vpop.eup %83  ;;  %v35_v13 = vmul.f32 %v82_v10, %v32_v8 }
  0x25   :  { %v42_v15 = vmul.f32 %v84_v12, %v33_v9 }
  0x26   :  { %v37_v16 = vsel %vm36_vm0, %v32_v8, %v35_v13 }
  0x27   :  { %v40_v17 = vsel %vm38_vm1, %v39_v11, %v37_v16  ;;  %v44_v18 = vsel %vm43_vm2, %v33_v9, %v42_v15 }
  0x28   :  { %v47_v19 = vsel %vm45_vm3, %v46_v14, %v44_v18 }
  0x29   :  { %v48_v20 = vadd.f32 %v47_v19, %v40_v17 }
  0x2b   :  { %49 = vadd.xlane.f32.xlu0 %v48_v20 }
  0xb4   :  { %v50_v21 = vpop.xlane.xlu0 %49 }
  0xb5   :  { %v51_v22 = vrot.slane %v50_v21, 4 }
  0xb7   :  { %v52_v23 = vadd.f32 %v51_v22, %v50_v21 }
  0xb9   :  { %v53_v24 = vrot.slane %v52_v23, 2 }
  0xbb   :  { %v54_v25 = vadd.f32 %v53_v24, %v52_v23 }
  0xbd   :  { %v55_v26 = vrot.slane %v54_v25, 1 }
  0xbf   :  { %v56_v27 = vadd.f32 %v55_v26, %v54_v25 }
  0xc1   :  { %75 = vpush %v56_v27 }
  0xf2   :  { %s76_s14 = spop %75 }
  0xf3   :  { %v58_v28 = vstv %s76_s14 }
  0xf4   :  { %59 = vst [vmem:[#allocation5] sm:$0xff] %v58_v28 }
  0xf5   :  { %116 = shalt.err (!%p113_p9)
}
  0xf6   :  { %69 = dma.vmem_to_hbm [thread:$0]  %s67_s13, 128, %s150_s1, [#allocation4]  }
  0xf7   :  { %127 = dma.done.wait [#allocation4], 128  }
  0xf8   :  { %128 = vsyncadd [#allocation4], 4294967168 }
  0xf9   :  { %73 = vsyncpa [#allocation3], 1 }
  0xfa   :  { %74 = vsyncpa [#allocation4], 1 }

</bundles_post_ra>
